<compile_context>
chip_gen: v5e
topology: v5e:2x2
jax: 0.10.0
libtpu: 0.0.40
codegen_flags: <defaults>
</compile_context>

<pallas_src>
import functools

import jax
import jax.numpy as jnp
from jax.experimental import pallas as pl
from jax.experimental.pallas import tpu as pltpu

LANE = 128
IN_FEATURES = 3 * 32 * 32   # 3072
H1 = 32
H2 = 64
OUT_FEATURES = 10


def _round_up(x, m):
    return (x + m - 1) // m * m


# ----------------------------------------------------------------------------
# Fused Pallas kernel: out = (relu(relu(x@W1 + b1) @ W2) @ W3) + b3
# All weight N dims are pre-padded to multiples of 128 (lane-dense stores).
# ----------------------------------------------------------------------------
def _mlp_fused_kernel(x_ref, w1_ref, b1_ref, w2_ref, w3_ref, b3_ref, o_ref, *,
                      mxu_dtype):
    # fc1 + ReLU  (MXU inputs in mxu_dtype, f32 accumulate, f32 epilogue)
    x = x_ref[...].astype(mxu_dtype)
    h1 = jnp.dot(x, w1_ref[...], preferred_element_type=jnp.float32)
    h1 = jnp.maximum(h1 + b1_ref[...], 0.0)
    # fc2 (no bias) + ReLU
    h2 = jnp.dot(h1.astype(mxu_dtype), w2_ref[...],
                 preferred_element_type=jnp.float32)
    h2 = jnp.maximum(h2, 0.0)
    # fc3 + bias
    out = jnp.dot(h2.astype(mxu_dtype), w3_ref[...],
                  preferred_element_type=jnp.float32)
    o_ref[...] = (out + b3_ref[...]).astype(o_ref.dtype)


# ----------------------------------------------------------------------------
# Parameter init (PyTorch Linear default: U(-1/sqrt(fan_in), 1/sqrt(fan_in)))
# ----------------------------------------------------------------------------
def init_params(key):
    ks = jax.random.split(key, 5)

    def u(k, shape, fan_in):
        bound = 1.0 / float(fan_in) ** 0.5
        return jax.random.uniform(k, shape, jnp.float32, -bound, bound)

    return {
        "fc1_w": u(ks[0], (H1, IN_FEATURES), IN_FEATURES),   # torch (out, in)
        "fc1_b": u(ks[1], (H1,), IN_FEATURES),
        "fc2_w": u(ks[2], (H2, H1), H1),                      # bias=False
        "fc3_w": u(ks[3], (OUT_FEATURES, H2), H2),
        "fc3_b": u(ks[4], (OUT_FEATURES,), H2),
    }


def prepare_params(raw, *, use_bf16=True):
    """One-time weight prep: (in, out) layout, zero-pad N to 128, cast MXU dtype."""
    wdt = jnp.bfloat16 if use_bf16 else jnp.float32
    n1p = _round_up(H1, LANE)
    n2p = _round_up(H2, LANE)
    n3p = _round_up(OUT_FEATURES, LANE)

    w1 = jnp.zeros((IN_FEATURES, n1p), jnp.float32).at[:, :H1].set(raw["fc1_w"].T)
    b1 = jnp.zeros((1, n1p), jnp.float32).at[0, :H1].set(raw["fc1_b"])
    w2 = jnp.zeros((n1p, n2p), jnp.float32).at[:H1, :H2].set(raw["fc2_w"].T)
    w3 = jnp.zeros((n2p, n3p), jnp.float32).at[:H2, :OUT_FEATURES].set(raw["fc3_w"].T)
    b3 = jnp.zeros((1, n3p), jnp.float32).at[0, :OUT_FEATURES].set(raw["fc3_b"])

    return {
        "w1": w1.astype(wdt), "b1": b1,        # biases stay f32 (f32 epilogue)
        "w2": w2.astype(wdt),
        "w3": w3.astype(wdt), "b3": b3,
    }


def _choose_tm(batch, tm_max):
    """Pick the batch tile: as large as possible (HBM-bound), but keep >=2
    balanced grid steps when the batch is big enough so both v7x TensorCores
    get work (harmless on single-TC v5e/v6e)."""
    tm = min(tm_max, _round_up(batch, 8))
    if batch >= 256 and pl.cdiv(batch, tm) < 2:
        tm = _round_up(pl.cdiv(batch, 2), 8)
    return max(tm, 8)


# ----------------------------------------------------------------------------
# Forward
# ----------------------------------------------------------------------------
def mlp2_relu_forward(params, x, *, tm=512):
    """x: (B, 3072) float32 -> logits (B, 10) float32."""
    B, K = x.shape
    assert K == IN_FEATURES

    tm = _choose_tm(B, tm)
    grid_m = pl.cdiv(B, tm)        # ragged last block handled by Pallas; no jnp.pad

    n1p = params["w1"].shape[1]
    n2p = params["w2"].shape[1]
    n3p = params["w3"].shape[1]
    mxu_dtype = params["w1"].dtype

    flops = 2 * B * (K * n1p + n1p * n2p + n2p * n3p)
    bytes_accessed = (
        x.size * x.dtype.itemsize
        + sum(params[k].size * params[k].dtype.itemsize
              for k in ("w1", "b1", "w2", "w3", "b3"))
        + B * n3p * 4
    )

    # VMEM budget: 2 x-tile buffers + in-kernel bf16 copy + weights/out + slack.
    x_tile_bytes = tm * K * x.dtype.itemsize
    vmem_limit = max(32 * 1024 * 1024,
                     min(96 * 1024 * 1024, 3 * x_tile_bytes + (8 << 20)))

    kern = functools.partial(_mlp_fused_kernel, mxu_dtype=mxu_dtype)
    out = pl.pallas_call(
        kern,
        out_shape=jax.ShapeDtypeStruct((B, n3p), jnp.float32),
        grid=(grid_m,),
        in_specs=[
            pl.BlockSpec((tm, K), lambda i: (i, 0)),       # x tile (pipelined)
            pl.BlockSpec((K, n1p), lambda i: (0, 0)),      # W1 (resident)
            pl.BlockSpec((1, n1p), lambda i: (0, 0)),      # b1
            pl.BlockSpec((n1p, n2p), lambda i: (0, 0)),    # W2
            pl.BlockSpec((n2p, n3p), lambda i: (0, 0)),    # W3
            pl.BlockSpec((1, n3p), lambda i: (0, 0)),      # b3
        ],
        out_specs=pl.BlockSpec((tm, n3p), lambda i: (i, 0)),
        compiler_params=pltpu.CompilerParams(
            dimension_semantics=("parallel",),
            vmem_limit_bytes=int(vmem_limit),
        ),
        cost_estimate=pl.CostEstimate(
            flops=flops, transcendentals=0, bytes_accessed=bytes_accessed),
    )(x, params["w1"], params["b1"], params["w2"], params["w3"], params["b3"])

    return out[:, :OUT_FEATURES]


# Pure-JAX reference (f32) for a sanity check.
def _reference(raw, x):
    h1 = jnp.maximum(x @ raw["fc1_w"].T + raw["fc1_b"], 0.0)
    h2 = jnp.maximum(h1 @ raw["fc2_w"].T, 0.0)
    return h2 @ raw["fc3_w"].T + raw["fc3_b"]


if __name__ == "__main__":
    key = jax.random.PRNGKey(0)
    pkey, xkey = jax.random.split(key)

    raw = init_params(pkey)
    params = prepare_params(raw, use_bf16=True)   # bf16 MXU inputs, f32 accumulate

    # fc1 fixes the feature dim at 3*32*32 = 3072; small batch of 2.
    x = jax.random.normal(xkey, (2, IN_FEATURES), jnp.float32)

    fwd = jax.jit(mlp2_relu_forward)
    out = jax.block_until_ready(fwd(params, x))

    assert out.shape == (2, OUT_FEATURES) and out.dtype == jnp.float32
    ref = _reference(raw, x)
    assert bool(jnp.allclose(out, ref, atol=5e-2, rtol=5e-2)), "mismatch vs reference"
    print("KERNEL_OK")
</pallas_src>

<mosaic_0001>
module attributes {stable_mosaic.version = 11 : i64} {
  func.func @_mlp_fused_kernel(%arg0: i32, %arg1: memref<8x3072xf32, #tpu.memory_space<vmem>>, %arg2: memref<3072x128xbf16, #tpu.memory_space<vmem>>, %arg3: memref<1x128xf32, #tpu.memory_space<vmem>>, %arg4: memref<128x128xbf16, #tpu.memory_space<vmem>>, %arg5: memref<128x128xbf16, #tpu.memory_space<vmem>>, %arg6: memref<1x128xf32, #tpu.memory_space<vmem>>, %arg7: memref<8x128xf32, #tpu.memory_space<vmem>>) attributes {dimension_semantics = [#tpu.dimension_semantics<parallel>], iteration_bounds = array<i64: 1>, scalar_prefetch = 0 : i64, scratch_operands = 0 : i64, tpu.core_type = #tpu.core_type<tc>, window_params = [{transform_indices = @transform_0, window_bounds = array<i64: 8, 3072>}, {pipeline_mode = #tpu.pipeline_mode<synchronous>, transform_indices = @transform_1, window_bounds = array<i64: 3072, 128>}, {pipeline_mode = #tpu.pipeline_mode<synchronous>, transform_indices = @transform_2, window_bounds = array<i64: 1, 128>}, {pipeline_mode = #tpu.pipeline_mode<synchronous>, transform_indices = @transform_3, window_bounds = array<i64: 128, 128>}, {pipeline_mode = #tpu.pipeline_mode<synchronous>, transform_indices = @transform_4, window_bounds = array<i64: 128, 128>}, {pipeline_mode = #tpu.pipeline_mode<synchronous>, transform_indices = @transform_5, window_bounds = array<i64: 1, 128>}, {transform_indices = @transform_6, window_bounds = array<i64: 8, 128>}]} {
    %c0 = arith.constant 0 : index
    %c0_0 = arith.constant 0 : index
    %0 = vector.load %arg1[%c0, %c0_0] : memref<8x3072xf32, #tpu.memory_space<vmem>>, vector<8x3072xf32>
    %1 = arith.truncf %0 : vector<8x3072xf32> to vector<8x3072xbf16>
    %c0_1 = arith.constant 0 : index
    %c0_2 = arith.constant 0 : index
    %2 = vector.load %arg2[%c0_1, %c0_2] : memref<3072x128xbf16, #tpu.memory_space<vmem>>, vector<3072x128xbf16>
    %cst = arith.constant dense<0.000000e+00> : vector<8x128xf32>
    %3 = tpu.matmul %1, %2, %cst {dimension_numbers = #tpu.dot_dimension_numbers<[1], [0], [0], [1], [0, 0, 1, 1], [], []>} : vector<8x3072xbf16>, vector<3072x128xbf16>, vector<8x128xf32> -> vector<8x128xf32>
    %c0_3 = arith.constant 0 : index
    %c0_4 = arith.constant 0 : index
    %4 = vector.load %arg3[%c0_3, %c0_4] : memref<1x128xf32, #tpu.memory_space<vmem>>, vector<1x128xf32>
    %5 = vector.broadcast %4 : vector<1x128xf32> to vector<8x128xf32>
    %6 = arith.addf %3, %5 : vector<8x128xf32>
    %cst_5 = arith.constant 0.000000e+00 : f32
    %7 = vector.broadcast %cst_5 : f32 to vector<8x128xf32>
    %8 = arith.maximumf %6, %7 : vector<8x128xf32>
    %9 = arith.truncf %8 : vector<8x128xf32> to vector<8x128xbf16>
    %c0_6 = arith.constant 0 : index
    %c0_7 = arith.constant 0 : index
    %10 = vector.load %arg4[%c0_6, %c0_7] : memref<128x128xbf16, #tpu.memory_space<vmem>>, vector<128x128xbf16>
    %cst_8 = arith.constant dense<0.000000e+00> : vector<8x128xf32>
    %11 = tpu.matmul %9, %10, %cst_8 {dimension_numbers = #tpu.dot_dimension_numbers<[1], [0], [0], [1], [0, 0, 1, 1], [], []>} : vector<8x128xbf16>, vector<128x128xbf16>, vector<8x128xf32> -> vector<8x128xf32>
    %cst_9 = arith.constant 0.000000e+00 : f32
    %12 = vector.broadcast %cst_9 : f32 to vector<8x128xf32>
    %13 = arith.maximumf %11, %12 : vector<8x128xf32>
    %14 = arith.truncf %13 : vector<8x128xf32> to vector<8x128xbf16>
    %c0_10 = arith.constant 0 : index
    %c0_11 = arith.constant 0 : index
    %15 = vector.load %arg5[%c0_10, %c0_11] : memref<128x128xbf16, #tpu.memory_space<vmem>>, vector<128x128xbf16>
    %cst_12 = arith.constant dense<0.000000e+00> : vector<8x128xf32>
    %16 = tpu.matmul %14, %15, %cst_12 {dimension_numbers = #tpu.dot_dimension_numbers<[1], [0], [0], [1], [0, 0, 1, 1], [], []>} : vector<8x128xbf16>, vector<128x128xbf16>, vector<8x128xf32> -> vector<8x128xf32>
    %c0_13 = arith.constant 0 : index
    %c0_14 = arith.constant 0 : index
    %17 = vector.load %arg6[%c0_13, %c0_14] : memref<1x128xf32, #tpu.memory_space<vmem>>, vector<1x128xf32>
    %18 = vector.broadcast %17 : vector<1x128xf32> to vector<8x128xf32>
    %19 = arith.addf %16, %18 : vector<8x128xf32>
    %c0_15 = arith.constant 0 : index
    %c0_16 = arith.constant 0 : index
    %20 = vector.load %arg7[%c0_15, %c0_16] : memref<8x128xf32, #tpu.memory_space<vmem>>, vector<8x128xf32>
    tpu.vector_store %arg7[%c0_15, %c0_16], %19 {strides = array<i32>} : memref<8x128xf32, #tpu.memory_space<vmem>>, vector<8x128xf32>,
    return
  }
  func.func @transform_0(%arg0: i32) -> (i32, i32) {
    %c0_i32 = arith.constant 0 : i32
    %c0_i32_0 = arith.constant 0 : i32
    return %arg0, %c0_i32 : i32, i32
  }
  func.func @transform_1(%arg0: i32) -> (i32, i32) {
    %c0_i32 = arith.constant 0 : i32
    %c0_i32_0 = arith.constant 0 : i32
    %c0_i32_1 = arith.constant 0 : i32
    return %c0_i32, %c0_i32_0 : i32, i32
  }
  func.func @transform_2(%arg0: i32) -> (i32, i32) {
    %c0_i32 = arith.constant 0 : i32
    %c0_i32_0 = arith.constant 0 : i32
    %c0_i32_1 = arith.constant 0 : i32
    return %c0_i32, %c0_i32_0 : i32, i32
  }
  func.func @transform_3(%arg0: i32) -> (i32, i32) {
    %c0_i32 = arith.constant 0 : i32
    %c0_i32_0 = arith.constant 0 : i32
    %c0_i32_1 = arith.constant 0 : i32
    return %c0_i32, %c0_i32_0 : i32, i32
  }
  func.func @transform_4(%arg0: i32) -> (i32, i32) {
    %c0_i32 = arith.constant 0 : i32
    %c0_i32_0 = arith.constant 0 : i32
    %c0_i32_1 = arith.constant 0 : i32
    return %c0_i32, %c0_i32_0 : i32, i32
  }
  func.func @transform_5(%arg0: i32) -> (i32, i32) {
    %c0_i32 = arith.constant 0 : i32
    %c0_i32_0 = arith.constant 0 : i32
    %c0_i32_1 = arith.constant 0 : i32
    return %c0_i32, %c0_i32_0 : i32, i32
  }
  func.func @transform_6(%arg0: i32) -> (i32, i32) {
    %c0_i32 = arith.constant 0 : i32
    %c0_i32_0 = arith.constant 0 : i32
    return %arg0, %c0_i32 : i32, i32
  }
}

</mosaic_0001>

<bundles_post_ra>
// kernel: mlp2_relu_forward.1
= control target key start
LH: loop header
LB: loop body
LE: loop exit
PB: predicated region body
PF: predicated region fallthrough
CT: control target
= control target key end

     0   :  { %11 = vsyncpa [#allocation3], 0  ;;  %s3613_s0 = inlined_call_operand.hbm [shape: f32[2,3072], index: 0, kind: input, shape index: {}]   ;;  %s3614_s1 = inlined_call_operand.hbm [shape: bf16[3072,128], index: 1, kind: input, shape index: {}]   ;;  %s3615_s2 = inlined_call_operand.hbm [shape: f32[1,128], index: 2, kind: input, shape index: {}]   ;;  %s3616_s3 = inlined_call_operand.hbm [shape: bf16[128,128], index: 3, kind: input, shape index: {}]   ;;  %s3617_s4 = inlined_call_operand.hbm [shape: bf16[128,128], index: 4, kind: input, shape index: {}]   ;;  %s3618_s5 = inlined_call_operand.hbm [shape: f32[1,128], index: 5, kind: input, shape index: {}]   ;;  %s3619_s6 = inlined_call_operand.hbm [shape: f32[2,128], index: 6, kind: output, shape index: {}]  }
   0x1   :  { %12 = vsyncpa [#allocation6], 0 }
   0x2   :  { %13 = vsyncpa [#allocation9], 0 }
   0x3   :  { %14 = vsyncpa [#allocation12], 0 }
   0x4   :  { %15 = vsyncpa [#allocation4], 0  ;;  %s33_s23 = sshll.u32 %s3614_s1, 4  ;;  %s34_s23 = int_to_ptr.hbm [resolvable:$true] %s33_s23 }
   0x5   :  { %19 = vsyncadd [#allocation3], 2304  ;;  %s3535_s24 = smov [#allocation5]   ;;  %s57_s28 = sshll.u32 %s3616_s3, 4  ;;  %s58_s28 = int_to_ptr.hbm [resolvable:$true] %s57_s28 }
   0x6   :  { %s35_s25 = sshll.u32 %s3535_s24, 4  ;;  %s3536_s29 = smov 64   ;;  %s36_s25 = int_to_ptr.vmem [resolvable:$true] %s35_s25 }
   0x7   :  { %s3537_s30 = smov 4   ;;  %s3538_s7 = smov [#allocation8]  }
   0x8   :  { %41 = dma.hbm_to_vmem [thread:$0]  %s34_s23, 24576, %s36_s25, [#allocation6], %s3536_s29, %s3536_s29, %s3537_s30  }
   0x9   :  { %s59_s8 = sshll.u32 %s3538_s7, 4  ;;  %s20_s10 = sshll.u32 %s3613_s0, 4  ;;  %s60_s8 = int_to_ptr.vmem [resolvable:$true] %s59_s8  ;;  %s21_s10 = int_to_ptr.hbm [resolvable:$true] %s20_s10 }
   0xa   :  { %65 = dma.hbm_to_vmem [thread:$0]  %s58_s28, 1024, %s60_s8, [#allocation9], %s3536_s29, %s3536_s29, %s3537_s30  }
   0xb   :  { %s3539_s3 = smov [#allocation2]   ;;  %s47_s14 = sshll.u32 %s3615_s2, 4  ;;  %s48_s14 = int_to_ptr.hbm [resolvable:$true] %s47_s14 }
   0xc   :  { %s22_s11 = sshll.u32 %s3539_s3, 4  ;;  %s3540_s15 = smov 768   ;;  %s23_s11 = int_to_ptr.vmem [resolvable:$true] %s22_s11 }
   0xd   :  { %s3541_s16 = smov 48   ;;  %s3542_s17 = smov [#allocation7]  }
   0xe   :  { %28 = dma.hbm_to_vmem [thread:$0]  %s21_s10, 768, %s23_s11, [#allocation3], %s3540_s15, %s3540_s15, %s3541_s16  }
   0xf   :  { %s49_s18 = sshll.u32 %s3542_s17, 4  ;;  %s70_s20 = sshll.u32 %s3617_s4, 4  ;;  %s50_s18 = int_to_ptr.vmem [resolvable:$true] %s49_s18  ;;  %s71_s20 = int_to_ptr.hbm [resolvable:$true] %s70_s20 }
  0x10   :  { %52 = dma.hbm_to_vmem [thread:$0]  %s48_s14, 16, %s50_s18, [#allocation6]  }
  0x11   :  { %s84_s23 = sshll.u32 %s3618_s5, 4  ;;  %s3543_s24 = smov [#allocation10]   ;;  %s85_s23 = int_to_ptr.hbm [resolvable:$true] %s84_s23 }
  0x12   :  { %s72_s25 = sshll.u32 %s3543_s24, 4  ;;  %s3544_s2 = smov [#allocation11]   ;;  %s73_s25 = int_to_ptr.vmem [resolvable:$true] %s72_s25 }
  0x13   :  { %78 = dma.hbm_to_vmem [thread:$0]  %s71_s20, 1024, %s73_s25, [#allocation9], %s3536_s29, %s3536_s29, %s3537_s30  }
  0x14   :  { %s86_s26 = sshll.u32 %s3544_s2, 4  ;;  %s87_s26 = int_to_ptr.vmem [resolvable:$true] %s86_s26 }
  0x15   :  { %89 = dma.hbm_to_vmem [thread:$0]  %s85_s23, 16, %s87_s26, [#allocation12]  }
  0x16   :  { %3525 = dma.done.wait [#allocation3], 3072  }
  0x17   :  { %3526 = vsyncadd [#allocation3], 4294964224 }
  0x18   :  { %3527 = dma.done.wait [#allocation6], 24592  }
  0x19   :  { %3528 = vsyncadd [#allocation6], 4294942704 }
  0x1a   :  { %3529 = dma.done.wait [#allocation9], 2048  }
  0x1b   :  { %3530 = vsyncadd [#allocation9], 4294965248 }
  0x1c   :  { %3531 = dma.done.wait [#allocation12], 16  }
  0x1d   :  { %3532 = vsyncadd [#allocation12], 4294967280  ;;  %v3141_v0 = vld [vmem:[#allocation5 + $0x38] sm:$0xff]  ;;  %v3140_v4 = vld [vmem:[#allocation5 + $0x30] sm:$0xff] }
  0x1e   :  { %v3149_v1 = vld [vmem:[#allocation5 + $0x78] sm:$0xff]  ;;  %1805 = vmatpush.bf16.msra.mxu0 %v3141_v0  ;;  %v3148_v5 = vld [vmem:[#allocation5 + $0x70] sm:$0xff]  ;;  %v3139_v8 = vld [vmem:[#allocation5 + $0x28] sm:$0xff] }
  0x1f   :  { %v3157_v2 = vld [vmem:[#allocation5 + $0xb8] sm:$0xff]  ;;  %1818 = vmatpush.bf16.msra.mxu1 %v3149_v1  ;;  %v3156_v6 = vld [vmem:[#allocation5 + $0xb0] sm:$0xff]  ;;  %v3147_v9 = vld [vmem:[#allocation5 + $0x68] sm:$0xff] }
  0x20   :  { %v3165_v3 = vld [vmem:[#allocation5 + $0xf8] sm:$0xff]  ;;  %1831 = vmatpush.bf16.msra.mxu2 %v3157_v2  ;;  %v3164_v7 = vld [vmem:[#allocation5 + $0xf0] sm:$0xff]  ;;  %v3155_v10 = vld [vmem:[#allocation5 + $0xa8] sm:$0xff] }
  0x21   :  { %1844 = vmatpush.bf16.msra.mxu3 %v3165_v3  ;;  %v3163_v11 = vld [vmem:[#allocation5 + $0xe8] sm:$0xff]  ;;  %v3138_v12 = vld [vmem:[#allocation5 + $0x20] sm:$0xff]  ;;  %v3137_v16 = vld [vmem:[#allocation5 + $0x18] sm:$0xff] }
  0x22   :  { %1806 = vmatpush.bf16.msra.mxu0 %v3140_v4  ;;  %v3146_v13 = vld [vmem:[#allocation5 + $0x60] sm:$0xff]  ;;  %v3145_v17 = vld [vmem:[#allocation5 + $0x58] sm:$0xff]  ;;  %v3136_v20 = vld [vmem:[#allocation5 + $0x10] sm:$0xff] }
  0x23   :  { %1819 = vmatpush.bf16.msra.mxu1 %v3148_v5  ;;  %v3154_v14 = vld [vmem:[#allocation5 + $0xa0] sm:$0xff]  ;;  %v3153_v18 = vld [vmem:[#allocation5 + $0x98] sm:$0xff]  ;;  %v3144_v21 = vld [vmem:[#allocation5 + $0x50] sm:$0xff] }
  0x24   :  { %1832 = vmatpush.bf16.msra.mxu2 %v3156_v6  ;;  %v3162_v15 = vld [vmem:[#allocation5 + $0xe0] sm:$0xff]  ;;  %v3161_v19 = vld [vmem:[#allocation5 + $0xd8] sm:$0xff]  ;;  %v120_v23 = vld [vmem:[#allocation2 + $0x30] sm:$0xff] }
  0x25   :  { %1845 = vmatpush.bf16.msra.mxu3 %v3164_v7  ;;  %v114_v22 = vld [vmem:[#allocation2] sm:$0xff]  ;;  %v132_v25 = vld [vmem:[#allocation2 + $0x90] sm:$0xff]  ;;  %164 = vst [vmem:[#allocation1 + $0x1] ss:$4 sm:$0xff] %v120_v23  ;;  %v3135_v28 = vld [vmem:[#allocation5 + $0x8] sm:$0xff] }
  0x26   :  { %1807 = vmatpush.bf16.msra.mxu0 %v3139_v8  ;;  %v126_v24 = vld [vmem:[#allocation2 + $0x60] sm:$0xff]  ;;  %162 = vst [vmem:[#allocation1] ss:$4 sm:$0xff] %v114_v22  ;;  %v3152_v26 = vld [vmem:[#allocation5 + $0x90] sm:$0xff]  ;;  %v3143_v29 = vld [vmem:[#allocation5 + $0x48] sm:$0xff] }
  0x27   :  { %1820 = vmatpush.bf16.msra.mxu1 %v3147_v9  ;;  %v3160_v27 = vld [vmem:[#allocation5 + $0xd0] sm:$0xff]  ;;  %166 = vst [vmem:[#allocation1 + $0x2] ss:$4 sm:$0xff] %v126_v24  ;;  %v3151_v30 = vld [vmem:[#allocation5 + $0x88] sm:$0xff]  ;;  %v3134_v32 = vld [vmem:[#allocation5] sm:$0xff] }
  0x28   :  { %1833 = vmatpush.bf16.msra.mxu2 %v3155_v10  ;;  %168 = vst [vmem:[#allocation1 + $0x3] ss:$4 sm:$0xff] %v132_v25  ;;  %v3159_v31 = vld [vmem:[#allocation5 + $0xc8] sm:$0xff]  ;;  %v3142_v33 = vld [vmem:[#allocation5 + $0x40] sm:$0xff]  ;;  %v3173_v36 = vld [vmem:[#allocation5 + $0x138] sm:$0xff] }
  0x29   :  { %1846 = vmatpush.bf16.msra.mxu3 %v3163_v11  ;;  %v3150_v34 = vld [vmem:[#allocation5 + $0x80] sm:$0xff]  ;;  %v3181_v37 = vld [vmem:[#allocation5 + $0x178] sm:$0xff]  ;;  %v116_v40 = vld [vmem:[#allocation2 + $0x10] sm:$0xff] }
  0x2a   :  { %1808 = vmatpush.bf16.msra.mxu0 %v3138_v12  ;;  %v3158_v35 = vld [vmem:[#allocation5 + $0xc0] sm:$0xff]  ;;  %v3189_v38 = vld [vmem:[#allocation5 + $0x1b8] sm:$0xff]  ;;  %v128_v42 = vld [vmem:[#allocation2 + $0x70] sm:$0xff] }
  0x2b   :  { %1821 = vmatpush.bf16.msra.mxu1 %v3146_v13  ;;  %v3197_v39 = vld [vmem:[#allocation5 + $0x1f8] sm:$0xff]  ;;  %v122_v41 = vld [vmem:[#allocation2 + $0x40] sm:$0xff]  ;;  %v115_v52 = vld [vmem:[#allocation2 + $0x8] sm:$0xff] }
  0x2c   :  { %1834 = vmatpush.bf16.msra.mxu2 %v3154_v14  ;;  %v134_v49 = vld [vmem:[#allocation2 + $0xa0] sm:$0xff]  ;;  %v3172_v53 = vld [vmem:[#allocation5 + $0x130] sm:$0xff]  ;;  %v121_v55 = vld [vmem:[#allocation2 + $0x38] sm:$0xff]  ;;  %170 = vst [vmem:[#allocation1 + $0x20] ss:$4 sm:$0xff] %v115_v52 }
  0x2d   :  { %1847 = vmatpush.bf16.msra.mxu3 %v3162_v15  ;;  %v3180_v54 = vld [vmem:[#allocation5 + $0x170] sm:$0xff]  ;;  %v127_v58 = vld [vmem:[#allocation2 + $0x68] sm:$0xff]  ;;  %v133_v59 = vld [vmem:[#allocation2 + $0x98] sm:$0xff]  ;;  %172 = vst [vmem:[#allocation1 + $0x21] ss:$4 sm:$0xff] %v121_v55 }
  0x2e   :  { %1809 = vmatpush.bf16.msra.mxu0 %v3137_v16  ;;  %v3188_v56 = vld [vmem:[#allocation5 + $0x1b0] sm:$0xff]  ;;  %v3171_v60 = vld [vmem:[#allocation5 + $0x128] sm:$0xff]  ;;  %174 = vst [vmem:[#allocation1 + $0x22] ss:$4 sm:$0xff] %v127_v58  ;;  %v3170_v0 = vld [vmem:[#allocation5 + $0x120] sm:$0xff] }
  0x2f   :  { %1822 = vmatpush.bf16.msra.mxu1 %v3145_v17  ;;  %v179_v43 = vld.sshfl [vmem:[#allocation1 + $0x10] sm:$0xff pattern:$0x73625140]  ;;  %v177_v44 = vld.sshfl [vmem:[#allocation1] sm:$0xff pattern:$0x73625140] }
  0x30   :  { %1835 = vmatpush.bf16.msra.mxu2 %v3153_v18  ;;  %v180_v45 = vld.sshfl [vmem:[#allocation1 + $0x18] sm:$0xff pattern:$0x73625140]  ;;  %v178_v46 = vld.sshfl [vmem:[#allocation1 + $0x8] sm:$0xff pattern:$0x73625140]  ;;  %v243_v47 = vpack.c.bf16 %v179_v43, %v179_v43  ;;  %v241_v48 = vpack.c.bf16 %v177_v44, %v177_v44 }
  0x31   :  { %1848 = vmatpush.bf16.msra.mxu3 %v3161_v19  ;;  %185 = vst [vmem:[#allocation1] ss:$4 sm:$0xff] %v116_v40  ;;  %v244_v50 = vpack.c.bf16 %v180_v45, %v180_v45  ;;  %v242_v51 = vpack.c.bf16 %v178_v46, %v178_v46  ;;  %v3196_v57 = vld [vmem:[#allocation5 + $0x1f0] sm:$0xff]  ;;  %v3179_v61 = vld [vmem:[#allocation5 + $0x168] sm:$0xff]  ;;  %v3178_v1 = vld [vmem:[#allocation5 + $0x160] sm:$0xff] }
  0x32   :  { %1810 = vmatpush.bf16.msra.mxu0 %v3136_v20  ;;  %186 = vst [vmem:[#allocation1 + $0x1] ss:$4 sm:$0xff] %v122_v41  ;;  %v3187_v62 = vld [vmem:[#allocation5 + $0x1a8] sm:$0xff]  ;;  %v3186_v2 = vld [vmem:[#allocation5 + $0x1a0] sm:$0xff]  ;;  %v3169_v4 = vld [vmem:[#allocation5 + $0x118] sm:$0xff] }
  0x33   :  { %1823 = vmatpush.bf16.msra.mxu1 %v3144_v21  ;;  %187 = vst [vmem:[#allocation1 + $0x2] ss:$4 sm:$0xff] %v128_v42  ;;  %v3195_v63 = vld [vmem:[#allocation5 + $0x1e8] sm:$0xff]  ;;  %v3194_v3 = vld [vmem:[#allocation5 + $0x1e0] sm:$0xff]  ;;  %v3177_v5 = vld [vmem:[#allocation5 + $0x158] sm:$0xff] }
  0x34   :  { %1836 = vmatpush.bf16.msra.mxu2 %v3152_v26  ;;  %188 = vst [vmem:[#allocation1 + $0x3] ss:$4 sm:$0xff] %v134_v49  ;;  %v3185_v6 = vld [vmem:[#allocation5 + $0x198] sm:$0xff]  ;;  %v123_v9 = vld [vmem:[#allocation2 + $0x48] sm:$0xff]  ;;  %v3168_v16 = vld [vmem:[#allocation5 + $0x110] sm:$0xff] }
  0x35   :  { %1849 = vmatpush.bf16.msra.mxu3 %v3160_v27  ;;  %176 = vst [vmem:[#allocation1 + $0x23] ss:$4 sm:$0xff] %v133_v59  ;;  %v3193_v7 = vld [vmem:[#allocation5 + $0x1d8] sm:$0xff]  ;;  %v135_v15 = vld [vmem:[#allocation2 + $0xa8] sm:$0xff]  ;;  %v3176_v17 = vld [vmem:[#allocation5 + $0x150] sm:$0xff] }
  0x36   :  { %1811 = vmatpush.bf16.msra.mxu0 %v3135_v28  ;;  %v117_v8 = vld [vmem:[#allocation2 + $0x18] sm:$0xff]  ;;  %v3184_v18 = vld [vmem:[#allocation5 + $0x190] sm:$0xff]  ;;  %v3167_v20 = vld [vmem:[#allocation5 + $0x108] sm:$0xff] }
  0x37   :  { %1824 = vmatpush.bf16.msra.mxu1 %v3143_v29  ;;  %v129_v10 = vld [vmem:[#allocation2 + $0x78] sm:$0xff]  ;;  %v3192_v19 = vld [vmem:[#allocation5 + $0x1d0] sm:$0xff]  ;;  %v3175_v21 = vld [vmem:[#allocation5 + $0x148] sm:$0xff] }
  0x38   :  { %1837 = vmatpush.bf16.msra.mxu2 %v3151_v30  ;;  %v3183_v22 = vld [vmem:[#allocation5 + $0x188] sm:$0xff]  ;;  %v3166_v24 = vld [vmem:[#allocation5 + $0x100] sm:$0xff]  ;;  %v3205_v28 = vld [vmem:[#allocation5 + $0x238] sm:$0xff] }
  0x39   :  { %1850 = vmatpush.bf16.msra.mxu3 %v3159_v31  ;;  %v3191_v23 = vld [vmem:[#allocation5 + $0x1c8] sm:$0xff]  ;;  %v3174_v25 = vld [vmem:[#allocation5 + $0x140] sm:$0xff]  ;;  %v3213_v29 = vld [vmem:[#allocation5 + $0x278] sm:$0xff] }
  0x3a   :  { %1812 = vmatpush.bf16.msra.mxu0 %v3134_v32  ;;  %v3182_v26 = vld [vmem:[#allocation5 + $0x180] sm:$0xff]  ;;  %v3221_v30 = vld [vmem:[#allocation5 + $0x2b8] sm:$0xff]  ;;  %v3203_v40 = vld [vmem:[#allocation5 + $0x228] sm:$0xff] }
  0x3b   :  { %1825 = vmatpush.bf16.msra.mxu1 %v3142_v33  ;;  %v3190_v27 = vld [vmem:[#allocation5 + $0x1c0] sm:$0xff]  ;;  %v3229_v31 = vld [vmem:[#allocation5 + $0x2f8] sm:$0xff]  ;;  %v3211_v41 = vld [vmem:[#allocation5 + $0x268] sm:$0xff] }
  0x3c   :  { %1838 = vmatpush.bf16.msra.mxu2 %v3150_v34  ;;  %v183_v11 = vld.sshfl [vmem:[#allocation1 + $0x30] sm:$0xff pattern:$0x73625140]  ;;  %v181_v12 = vld.sshfl [vmem:[#allocation1 + $0x20] sm:$0xff pattern:$0x73625140] }
  0x3d   :  { %1851 = vmatpush.bf16.msra.mxu3 %v3158_v35  ;;  %1813 = vmatmul.bf16.vlgmr.msra.gmra.mxu0 %v241_v48  ;;  %v184_v13 = vld.sshfl [vmem:[#allocation1 + $0x38] sm:$0xff pattern:$0x73625140]  ;;  %v182_v14 = vld.sshfl [vmem:[#allocation1 + $0x28] sm:$0xff pattern:$0x73625140]  ;;  %v247_v32 = vpack.c.bf16 %v183_v11, %v183_v11  ;;  %v245_v33 = vpack.c.bf16 %v181_v12, %v181_v12 }
  0x3e   :  { %1857 = vmatpush.bf16.msrb.mxu0 %v3173_v36  ;;  %1826 = vmatmul.bf16.vlgmr.msra.gmra.mxu1 %v242_v51  ;;  %189 = vst [vmem:[#allocation1 + $0x20] ss:$4 sm:$0xff] %v117_v8  ;;  %v248_v34 = vpack.c.bf16 %v184_v13, %v184_v13  ;;  %v246_v35 = vpack.c.bf16 %v182_v14, %v182_v14  ;;  %v3204_v36 = vld [vmem:[#allocation5 + $0x230] sm:$0xff]  ;;  %v3219_v42 = vld [vmem:[#allocation5 + $0x2a8] sm:$0xff]  ;;  %v3202_v44 = vld [vmem:[#allocation5 + $0x220] sm:$0xff] }
  0x3f   :  { %1870 = vmatpush.bf16.msrb.mxu1 %v3181_v37  ;;  %1839 = vmatmul.bf16.vlgmr.msra.gmra.mxu2 %v243_v47  ;;  %190 = vst [vmem:[#allocation1 + $0x21] ss:$4 sm:$0xff] %v123_v9  ;;  %v3212_v37 = vld [vmem:[#allocation5 + $0x270] sm:$0xff]  ;;  %v3227_v43 = vld [vmem:[#allocation5 + $0x2e8] sm:$0xff]  ;;  %v3210_v45 = vld [vmem:[#allocation5 + $0x260] sm:$0xff] }
  0x40   :  { %1883 = vmatpush.bf16.msrb.mxu2 %v3189_v38  ;;  %1852 = vmatmul.bf16.vlgmr.msra.gmra.mxu3 %v244_v50  ;;  %191 = vst [vmem:[#allocation1 + $0x22] ss:$4 sm:$0xff] %v129_v10  ;;  %v3220_v38 = vld [vmem:[#allocation5 + $0x2b0] sm:$0xff]  ;;  %v3218_v46 = vld [vmem:[#allocation5 + $0x2a0] sm:$0xff]  ;;  %v3201_v48 = vld [vmem:[#allocation5 + $0x218] sm:$0xff] }
  0x41   :  { %1896 = vmatpush.bf16.msrb.mxu3 %v3197_v39  ;;  %192 = vst [vmem:[#allocation1 + $0x23] ss:$4 sm:$0xff] %v135_v15  ;;  %v3228_v39 = vld [vmem:[#allocation5 + $0x2f0] sm:$0xff]  ;;  %v3226_v47 = vld [vmem:[#allocation5 + $0x2e0] sm:$0xff]  ;;  %v3209_v49 = vld [vmem:[#allocation5 + $0x258] sm:$0xff] }
  0x42   :  { %1858 = vmatpush.bf16.msrb.mxu0 %v3172_v53  ;;  %v3217_v50 = vld [vmem:[#allocation5 + $0x298] sm:$0xff]  ;;  %v3200_v52 = vld [vmem:[#allocation5 + $0x210] sm:$0xff]  ;;  %v3215_v58 = vld [vmem:[#allocation5 + $0x288] sm:$0xff] }
  0x43   :  { %1871 = vmatpush.bf16.msrb.mxu1 %v3180_v54  ;;  %v3225_v51 = vld [vmem:[#allocation5 + $0x2d8] sm:$0xff]  ;;  %v3208_v53 = vld [vmem:[#allocation5 + $0x250] sm:$0xff]  ;;  %v3223_v59 = vld [vmem:[#allocation5 + $0x2c8] sm:$0xff] }
  0x44   :  { %1884 = vmatpush.bf16.msrb.mxu2 %v3188_v56  ;;  %v3216_v54 = vld [vmem:[#allocation5 + $0x290] sm:$0xff]  ;;  %v3199_v56 = vld [vmem:[#allocation5 + $0x208] sm:$0xff] }
  0x45   :  { %1897 = vmatpush.bf16.msrb.mxu3 %v3196_v57  ;;  %v3224_v55 = vld [vmem:[#allocation5 + $0x2d0] sm:$0xff]  ;;  %v3207_v57 = vld [vmem:[#allocation5 + $0x248] sm:$0xff] }
  0x46   :  { %1859 = vmatpush.bf16.msrb.mxu0 %v3171_v60  ;;  %v3198_v60 = vld [vmem:[#allocation5 + $0x200] sm:$0xff]  ;;  %v3236_v12 = vld [vmem:[#allocation5 + $0x330] sm:$0xff] }
  0x47   :  { %1872 = vmatpush.bf16.msrb.mxu1 %v3179_v61  ;;  %v3206_v61 = vld [vmem:[#allocation5 + $0x240] sm:$0xff]  ;;  %v3244_v13 = vld [vmem:[#allocation5 + $0x370] sm:$0xff] }
  0x48   :  { %1885 = vmatpush.bf16.msrb.mxu2 %v3187_v62  ;;  %v3214_v62 = vld [vmem:[#allocation5 + $0x280] sm:$0xff]  ;;  %v3252_v14 = vld [vmem:[#allocation5 + $0x3b0] sm:$0xff] }
  0x49   :  { %1898 = vmatpush.bf16.msrb.mxu3 %v3195_v63  ;;  %v3222_v63 = vld [vmem:[#allocation5 + $0x2c0] sm:$0xff]  ;;  %v3260_v15 = vld [vmem:[#allocation5 + $0x3f0] sm:$0xff] }
  0x4a   :  { %1860 = vmatpush.bf16.msrb.mxu0 %v3170_v0  ;;  %v3237_v0 = vld [vmem:[#allocation5 + $0x338] sm:$0xff] }
  0x4b   :  { %1873 = vmatpush.bf16.msrb.mxu1 %v3178_v1  ;;  %v3245_v1 = vld [vmem:[#allocation5 + $0x378] sm:$0xff] }
  0x4c   :  { %1886 = vmatpush.bf16.msrb.mxu2 %v3186_v2  ;;  %v193_v2 = vld.sshfl [vmem:[#allocation1] sm:$0xff pattern:$0x73625140] }
  0x4d   :  { %1899 = vmatpush.bf16.msrb.mxu3 %v3194_v3  ;;  %v195_v3 = vld.sshfl [vmem:[#allocation1 + $0x10] sm:$0xff pattern:$0x73625140]  ;;  %v249_v8 = vpack.c.bf16 %v193_v2, %v193_v2  ;;  %v3282_v2 = vld [vmem:[#allocation5 + $0x4a0] sm:$0xff] }
  0x4e   :  { %1861 = vmatpush.bf16.msrb.mxu0 %v3169_v4  ;;  %v194_v4 = vld.sshfl [vmem:[#allocation1 + $0x8] sm:$0xff pattern:$0x73625140]  ;;  %v251_v9 = vpack.c.bf16 %v195_v3, %v195_v3 }
  0x4f   :  { %1874 = vmatpush.bf16.msrb.mxu1 %v3177_v5  ;;  %v196_v5 = vld.sshfl [vmem:[#allocation1 + $0x18] sm:$0xff pattern:$0x73625140]  ;;  %v250_v10 = vpack.c.bf16 %v194_v4, %v194_v4  ;;  %v3290_v3 = vld [vmem:[#allocation5 + $0x4e0] sm:$0xff]  ;;  %v3265_v4 = vld [vmem:[#allocation5 + $0x418] sm:$0xff] }
  0x50   :  { %1887 = vmatpush.bf16.msrb.mxu2 %v3185_v6  ;;  %v3253_v6 = vld [vmem:[#allocation5 + $0x3b8] sm:$0xff]  ;;  %v252_v11 = vpack.c.bf16 %v196_v5, %v196_v5 }
  0x51   :  { %1900 = vmatpush.bf16.msrb.mxu3 %v3193_v7  ;;  %v3261_v7 = vld [vmem:[#allocation5 + $0x3f8] sm:$0xff] }
  0x52   :  { %1862 = vmatpush.bf16.msrb.mxu0 %v3168_v16  ;;  %v3235_v16 = vld [vmem:[#allocation5 + $0x328] sm:$0xff]  ;;  %v3273_v5 = vld [vmem:[#allocation5 + $0x458] sm:$0xff] }
  0x53   :  { %1875 = vmatpush.bf16.msrb.mxu1 %v3176_v17  ;;  %v3243_v17 = vld [vmem:[#allocation5 + $0x368] sm:$0xff] }
  0x54   :  { %1888 = vmatpush.bf16.msrb.mxu2 %v3184_v18  ;;  %v3251_v18 = vld [vmem:[#allocation5 + $0x3a8] sm:$0xff] }
  0x55   :  { %1901 = vmatpush.bf16.msrb.mxu3 %v3192_v19  ;;  %v3259_v19 = vld [vmem:[#allocation5 + $0x3e8] sm:$0xff] }
  0x56   :  { %1863 = vmatpush.bf16.msrb.mxu0 %v3167_v20  ;;  %v3234_v20 = vld [vmem:[#allocation5 + $0x320] sm:$0xff] }
  0x57   :  { %1876 = vmatpush.bf16.msrb.mxu1 %v3175_v21  ;;  %v3242_v21 = vld [vmem:[#allocation5 + $0x360] sm:$0xff] }
  0x58   :  { %1889 = vmatpush.bf16.msrb.mxu2 %v3183_v22  ;;  %v3250_v22 = vld [vmem:[#allocation5 + $0x3a0] sm:$0xff] }
  0x59   :  { %1902 = vmatpush.bf16.msrb.mxu3 %v3191_v23  ;;  %v3258_v23 = vld [vmem:[#allocation5 + $0x3e0] sm:$0xff] }
  0x5a   :  { %1864 = vmatpush.bf16.msrb.mxu0 %v3166_v24  ;;  %v3233_v24 = vld [vmem:[#allocation5 + $0x318] sm:$0xff] }
  0x5b   :  { %1877 = vmatpush.bf16.msrb.mxu1 %v3174_v25  ;;  %v3241_v25 = vld [vmem:[#allocation5 + $0x358] sm:$0xff] }
  0x5c   :  { %1890 = vmatpush.bf16.msrb.mxu2 %v3182_v26  ;;  %v3249_v26 = vld [vmem:[#allocation5 + $0x398] sm:$0xff] }
  0x5d   :  { %1903 = vmatpush.bf16.msrb.mxu3 %v3190_v27  ;;  %1865 = vmatmul.bf16.vlgmr.msrb.gmra.mxu0 %v245_v33  ;;  %v3257_v27 = vld [vmem:[#allocation5 + $0x3d8] sm:$0xff]  ;;  %v3239_v33 = vld [vmem:[#allocation5 + $0x348] sm:$0xff] }
  0x5e   :  { %1909 = vmatpush.bf16.msra.mxu0 %v3205_v28  ;;  %1878 = vmatmul.bf16.vlgmr.msrb.gmra.mxu1 %v246_v35  ;;  %v3232_v28 = vld [vmem:[#allocation5 + $0x310] sm:$0xff] }
  0x5f   :  { %1922 = vmatpush.bf16.msra.mxu1 %v3213_v29  ;;  %1891 = vmatmul.bf16.vlgmr.msrb.gmra.mxu2 %v247_v32  ;;  %v3240_v29 = vld [vmem:[#allocation5 + $0x350] sm:$0xff]  ;;  %v3231_v32 = vld [vmem:[#allocation5 + $0x308] sm:$0xff] }
  0x60   :  { %1935 = vmatpush.bf16.msra.mxu2 %v3221_v30  ;;  %1904 = vmatmul.bf16.vlgmr.msrb.gmra.mxu3 %v248_v34  ;;  %v3248_v30 = vld [vmem:[#allocation5 + $0x390] sm:$0xff]  ;;  %v118_v34 = vld [vmem:[#allocation2 + $0x20] sm:$0xff] }
  0x61   :  { %1948 = vmatpush.bf16.msra.mxu3 %v3229_v31  ;;  %v3256_v31 = vld [vmem:[#allocation5 + $0x3d0] sm:$0xff]  ;;  %201 = vst [vmem:[#allocation1] ss:$4 sm:$0xff] %v118_v34 }
  0x62   :  { %1910 = vmatpush.bf16.msra.mxu0 %v3204_v36  ;;  %v124_v35 = vld [vmem:[#allocation2 + $0x50] sm:$0xff]  ;;  %v130_v36 = vld [vmem:[#allocation2 + $0x80] sm:$0xff] }
  0x63   :  { %1923 = vmatpush.bf16.msra.mxu1 %v3212_v37  ;;  %v3247_v37 = vld [vmem:[#allocation5 + $0x388] sm:$0xff]  ;;  %202 = vst [vmem:[#allocation1 + $0x1] ss:$4 sm:$0xff] %v124_v35 }
  0x64   :  { %1936 = vmatpush.bf16.msra.mxu2 %v3220_v38  ;;  %v3255_v38 = vld [vmem:[#allocation5 + $0x3c8] sm:$0xff]  ;;  %203 = vst [vmem:[#allocation1 + $0x2] ss:$4 sm:$0xff] %v130_v36  ;;  %v3300_v36 = vld [vmem:[#allocation5 + $0x530] sm:$0xff] }
  0x65   :  { %1949 = vmatpush.bf16.msra.mxu3 %v3228_v39  ;;  %v136_v39 = vld [vmem:[#allocation2 + $0xb0] sm:$0xff] }
  0x66   :  { %1911 = vmatpush.bf16.msra.mxu0 %v3203_v40  ;;  %v3230_v40 = vld [vmem:[#allocation5 + $0x300] sm:$0xff]  ;;  %204 = vst [vmem:[#allocation1 + $0x3] ss:$4 sm:$0xff] %v136_v39  ;;  %v3324_v39 = vld [vmem:[#allocation5 + $0x5f0] sm:$0xff] }
  0x67   :  { %1924 = vmatpush.bf16.msra.mxu1 %v3211_v41  ;;  %v3238_v41 = vld [vmem:[#allocation5 + $0x340] sm:$0xff] }
  0x68   :  { %1937 = vmatpush.bf16.msra.mxu2 %v3219_v42  ;;  %v3246_v42 = vld [vmem:[#allocation5 + $0x380] sm:$0xff] }
  0x69   :  { %1950 = vmatpush.bf16.msra.mxu3 %v3227_v43  ;;  %v3254_v43 = vld [vmem:[#allocation5 + $0x3c0] sm:$0xff] }
  0x6a   :  { %1912 = vmatpush.bf16.msra.mxu0 %v3202_v44  ;;  %v3269_v44 = vld [vmem:[#allocation5 + $0x438] sm:$0xff] }
  0x6b   :  { %1925 = vmatpush.bf16.msra.mxu1 %v3210_v45  ;;  %v3277_v45 = vld [vmem:[#allocation5 + $0x478] sm:$0xff] }
  0x6c   :  { %1938 = vmatpush.bf16.msra.mxu2 %v3218_v46  ;;  %v197_v46 = vld.sshfl [vmem:[#allocation1 + $0x20] sm:$0xff pattern:$0x73625140] }
  0x6d   :  { %1951 = vmatpush.bf16.msra.mxu3 %v3226_v47  ;;  %v199_v47 = vld.sshfl [vmem:[#allocation1 + $0x30] sm:$0xff pattern:$0x73625140] }
  0x6e   :  { %1913 = vmatpush.bf16.msra.mxu0 %v3201_v48  ;;  %v198_v48 = vld.sshfl [vmem:[#allocation1 + $0x28] sm:$0xff pattern:$0x73625140] }
  0x6f   :  { %1926 = vmatpush.bf16.msra.mxu1 %v3209_v49  ;;  %v200_v49 = vld.sshfl [vmem:[#allocation1 + $0x38] sm:$0xff pattern:$0x73625140] }
  0x70   :  { %1939 = vmatpush.bf16.msra.mxu2 %v3217_v50  ;;  %v3285_v50 = vld [vmem:[#allocation5 + $0x4b8] sm:$0xff] }
  0x71   :  { %1952 = vmatpush.bf16.msra.mxu3 %v3225_v51  ;;  %v3293_v51 = vld [vmem:[#allocation5 + $0x4f8] sm:$0xff] }
  0x72   :  { %1914 = vmatpush.bf16.msra.mxu0 %v3200_v52  ;;  %v253_v52 = vpack.c.bf16 %v197_v46, %v197_v46  ;;  %v3298_v46 = vld [vmem:[#allocation5 + $0x520] sm:$0xff] }
  0x73   :  { %1927 = vmatpush.bf16.msra.mxu1 %v3208_v53  ;;  %v255_v53 = vpack.c.bf16 %v199_v47, %v199_v47  ;;  %v3306_v47 = vld [vmem:[#allocation5 + $0x560] sm:$0xff] }
  0x74   :  { %1940 = vmatpush.bf16.msra.mxu2 %v3216_v54  ;;  %v254_v54 = vpack.c.bf16 %v198_v48, %v198_v48 }
  0x75   :  { %1953 = vmatpush.bf16.msra.mxu3 %v3224_v55  ;;  %v256_v55 = vpack.c.bf16 %v200_v49, %v200_v49 }
  0x76   :  { %1915 = vmatpush.bf16.msra.mxu0 %v3199_v56  ;;  %v3268_v56 = vld [vmem:[#allocation5 + $0x430] sm:$0xff] }
  0x77   :  { %1928 = vmatpush.bf16.msra.mxu1 %v3207_v57  ;;  %v3276_v57 = vld [vmem:[#allocation5 + $0x470] sm:$0xff] }
  0x78   :  { %1941 = vmatpush.bf16.msra.mxu2 %v3215_v58  ;;  %v3284_v58 = vld [vmem:[#allocation5 + $0x4b0] sm:$0xff] }
  0x79   :  { %1954 = vmatpush.bf16.msra.mxu3 %v3223_v59  ;;  %v3292_v59 = vld [vmem:[#allocation5 + $0x4f0] sm:$0xff] }
  0x7a   :  { %1916 = vmatpush.bf16.msra.mxu0 %v3198_v60  ;;  %v3267_v60 = vld [vmem:[#allocation5 + $0x428] sm:$0xff] }
  0x7b   :  { %1929 = vmatpush.bf16.msra.mxu1 %v3206_v61  ;;  %v3275_v61 = vld [vmem:[#allocation5 + $0x468] sm:$0xff] }
  0x7c   :  { %1942 = vmatpush.bf16.msra.mxu2 %v3214_v62  ;;  %v3283_v62 = vld [vmem:[#allocation5 + $0x4a8] sm:$0xff] }
  0x7d   :  { %1955 = vmatpush.bf16.msra.mxu3 %v3222_v63  ;;  %1917 = vmatmul.bf16.vlgmr.msra.gmra.mxu0 %v249_v8  ;;  %v3291_v63 = vld [vmem:[#allocation5 + $0x4e8] sm:$0xff]  ;;  %v3264_v8 = vld [vmem:[#allocation5 + $0x410] sm:$0xff] }
  0x7e   :  { %1961 = vmatpush.bf16.msrb.mxu0 %v3237_v0  ;;  %1930 = vmatmul.bf16.vlgmr.msra.gmra.mxu1 %v250_v10  ;;  %v3266_v0 = vld [vmem:[#allocation5 + $0x420] sm:$0xff]  ;;  %v3280_v10 = vld [vmem:[#allocation5 + $0x490] sm:$0xff] }
  0x7f   :  { %1974 = vmatpush.bf16.msrb.mxu1 %v3245_v1  ;;  %1943 = vmatmul.bf16.vlgmr.msra.gmra.mxu2 %v251_v9  ;;  %v3274_v1 = vld [vmem:[#allocation5 + $0x460] sm:$0xff]  ;;  %v3272_v9 = vld [vmem:[#allocation5 + $0x450] sm:$0xff] }
  0x80   :  { %1987 = vmatpush.bf16.msrb.mxu2 %v3253_v6  ;;  %1956 = vmatmul.bf16.vlgmr.msra.gmra.mxu3 %v252_v11  ;;  %v3281_v6 = vld [vmem:[#allocation5 + $0x498] sm:$0xff]  ;;  %v3288_v11 = vld [vmem:[#allocation5 + $0x4d0] sm:$0xff] }
  0x81   :  { %2000 = vmatpush.bf16.msrb.mxu3 %v3261_v7  ;;  %v3289_v7 = vld [vmem:[#allocation5 + $0x4d8] sm:$0xff] }
  0x82   :  { %1962 = vmatpush.bf16.msrb.mxu0 %v3236_v12  ;;  %v3263_v12 = vld [vmem:[#allocation5 + $0x408] sm:$0xff] }
  0x83   :  { %1975 = vmatpush.bf16.msrb.mxu1 %v3244_v13  ;;  %v119_v13 = vld [vmem:[#allocation2 + $0x28] sm:$0xff] }
  0x84   :  { %1988 = vmatpush.bf16.msrb.mxu2 %v3252_v14  ;;  %v125_v14 = vld [vmem:[#allocation2 + $0x58] sm:$0xff]  ;;  %205 = vst [vmem:[#allocation1 + $0x20] ss:$4 sm:$0xff] %v119_v13 }
  0x85   :  { %2001 = vmatpush.bf16.msrb.mxu3 %v3260_v15  ;;  %v3271_v15 = vld [vmem:[#allocation5 + $0x448] sm:$0xff]  ;;  %206 = vst [vmem:[#allocation1 + $0x21] ss:$4 sm:$0xff] %v125_v14 }
  0x86   :  { %1963 = vmatpush.bf16.msrb.mxu0 %v3235_v16  ;;  %v131_v16 = vld [vmem:[#allocation2 + $0x88] sm:$0xff] }
  0x87   :  { %1976 = vmatpush.bf16.msrb.mxu1 %v3243_v17  ;;  %v137_v17 = vld [vmem:[#allocation2 + $0xb8] sm:$0xff]  ;;  %207 = vst [vmem:[#allocation1 + $0x22] ss:$4 sm:$0xff] %v131_v16 }
  0x88   :  { %1989 = vmatpush.bf16.msrb.mxu2 %v3251_v18  ;;  %v3279_v18 = vld [vmem:[#allocation5 + $0x488] sm:$0xff]  ;;  %208 = vst [vmem:[#allocation1 + $0x23] ss:$4 sm:$0xff] %v137_v17 }
  0x89   :  { %2002 = vmatpush.bf16.msrb.mxu3 %v3259_v19  ;;  %v3287_v19 = vld [vmem:[#allocation5 + $0x4c8] sm:$0xff] }
  0x8a   :  { %1964 = vmatpush.bf16.msrb.mxu0 %v3234_v20  ;;  %v3262_v20 = vld [vmem:[#allocation5 + $0x400] sm:$0xff] }
  0x8b   :  { %1977 = vmatpush.bf16.msrb.mxu1 %v3242_v21  ;;  %v3270_v21 = vld [vmem:[#allocation5 + $0x440] sm:$0xff] }
  0x8c   :  { %1990 = vmatpush.bf16.msrb.mxu2 %v3250_v22  ;;  %v3278_v22 = vld [vmem:[#allocation5 + $0x480] sm:$0xff] }
  0x8d   :  { %2003 = vmatpush.bf16.msrb.mxu3 %v3258_v23  ;;  %v3286_v23 = vld [vmem:[#allocation5 + $0x4c0] sm:$0xff] }
  0x8e   :  { %1965 = vmatpush.bf16.msrb.mxu0 %v3233_v24  ;;  %v3301_v24 = vld [vmem:[#allocation5 + $0x538] sm:$0xff] }
  0x8f   :  { %1978 = vmatpush.bf16.msrb.mxu1 %v3241_v25  ;;  %v3309_v25 = vld [vmem:[#allocation5 + $0x578] sm:$0xff]  ;;  %v214_v14 = vld.sshfl [vmem:[#allocation1 + $0x28] sm:$0xff pattern:$0x73625140] }
  0x90   :  { %1991 = vmatpush.bf16.msrb.mxu2 %v3249_v26  ;;  %v209_v26 = vld.sshfl [vmem:[#allocation1] sm:$0xff pattern:$0x73625140]  ;;  %v216_v16 = vld.sshfl [vmem:[#allocation1 + $0x38] sm:$0xff pattern:$0x73625140] }
  0x91   :  { %2004 = vmatpush.bf16.msrb.mxu3 %v3257_v27  ;;  %v211_v27 = vld.sshfl [vmem:[#allocation1 + $0x10] sm:$0xff pattern:$0x73625140]  ;;  %v213_v13 = vld.sshfl [vmem:[#allocation1 + $0x20] sm:$0xff pattern:$0x73625140] }
  0x92   :  { %1966 = vmatpush.bf16.msrb.mxu0 %v3232_v28  ;;  %v210_v28 = vld.sshfl [vmem:[#allocation1 + $0x8] sm:$0xff pattern:$0x73625140]  ;;  %v261_v17 = vpack.c.bf16 %v213_v13, %v213_v13 }
  0x93   :  { %1979 = vmatpush.bf16.msrb.mxu1 %v3240_v29  ;;  %v212_v29 = vld.sshfl [vmem:[#allocation1 + $0x18] sm:$0xff pattern:$0x73625140]  ;;  %v258_v34 = vpack.c.bf16 %v210_v28, %v210_v28 }
  0x94   :  { %1992 = vmatpush.bf16.msrb.mxu2 %v3248_v30  ;;  %v3317_v30 = vld [vmem:[#allocation5 + $0x5b8] sm:$0xff]  ;;  %v260_v35 = vpack.c.bf16 %v212_v29, %v212_v29 }
  0x95   :  { %2005 = vmatpush.bf16.msrb.mxu3 %v3256_v31  ;;  %v3325_v31 = vld [vmem:[#allocation5 + $0x5f8] sm:$0xff] }
  0x96   :  { %1967 = vmatpush.bf16.msrb.mxu0 %v3231_v32  ;;  %v257_v32 = vpack.c.bf16 %v209_v26, %v209_v26 }
  0x97   :  { %1980 = vmatpush.bf16.msrb.mxu1 %v3239_v33  ;;  %v259_v33 = vpack.c.bf16 %v211_v27, %v211_v27 }
  0x98   :  { %1993 = vmatpush.bf16.msrb.mxu2 %v3247_v37  ;;  %v3308_v37 = vld [vmem:[#allocation5 + $0x570] sm:$0xff] }
  0x99   :  { %2006 = vmatpush.bf16.msrb.mxu3 %v3255_v38  ;;  %v3316_v38 = vld [vmem:[#allocation5 + $0x5b0] sm:$0xff] }
  0x9a   :  { %1968 = vmatpush.bf16.msrb.mxu0 %v3230_v40  ;;  %v3299_v40 = vld [vmem:[#allocation5 + $0x528] sm:$0xff] }
  0x9b   :  { %1981 = vmatpush.bf16.msrb.mxu1 %v3238_v41  ;;  %v3307_v41 = vld [vmem:[#allocation5 + $0x568] sm:$0xff] }
  0x9c   :  { %1994 = vmatpush.bf16.msrb.mxu2 %v3246_v42  ;;  %v3355_v42 = vld [vmem:[#allocation7] ss:$0 sm:$0xff] }
  0x9d   :  { %2007 = vmatpush.bf16.msrb.mxu3 %v3254_v43  ;;  %1969 = vmatmul.bf16.vlgmr.msrb.gmra.mxu0 %v253_v52  ;;  %v3315_v43 = vld [vmem:[#allocation5 + $0x5a8] sm:$0xff] }
  0x9e   :  { %2013 = vmatpush.bf16.msra.mxu0 %v3269_v44  ;;  %1982 = vmatmul.bf16.vlgmr.msrb.gmra.mxu1 %v254_v54  ;;  %v3323_v44 = vld [vmem:[#allocation5 + $0x5e8] sm:$0xff]  ;;  %v3305_v54 = vld [vmem:[#allocation5 + $0x558] sm:$0xff] }
  0x9f   :  { %2026 = vmatpush.bf16.msra.mxu1 %v3277_v45  ;;  %1995 = vmatmul.bf16.vlgmr.msrb.gmra.mxu2 %v255_v53  ;;  %v3297_v53 = vld [vmem:[#allocation5 + $0x518] sm:$0xff] }
  0xa0   :  { %2039 = vmatpush.bf16.msra.mxu2 %v3285_v50  ;;  %2008 = vmatmul.bf16.vlgmr.msrb.gmra.mxu3 %v256_v55  ;;  %v3314_v50 = vld [vmem:[#allocation5 + $0x5a0] sm:$0xff]  ;;  %v3313_v55 = vld [vmem:[#allocation5 + $0x598] sm:$0xff] }
  0xa1   :  { %2052 = vmatpush.bf16.msra.mxu3 %v3293_v51  ;;  %v3322_v51 = vld [vmem:[#allocation5 + $0x5e0] sm:$0xff] }
  0xa2   :  { %2014 = vmatpush.bf16.msra.mxu0 %v3268_v56  ;;  %v3321_v56 = vld [vmem:[#allocation5 + $0x5d8] sm:$0xff] }
  0xa3   :  { %2027 = vmatpush.bf16.msra.mxu1 %v3276_v57 }
  0xa4   :  { %2040 = vmatpush.bf16.msra.mxu2 %v3284_v58 }
  0xa5   :  { %2053 = vmatpush.bf16.msra.mxu3 %v3292_v59 }
  0xa6   :  { %2015 = vmatpush.bf16.msra.mxu0 %v3267_v60 }
  0xa7   :  { %2028 = vmatpush.bf16.msra.mxu1 %v3275_v61  ;;  %v3296_v61 = vld [vmem:[#allocation5 + $0x510] sm:$0xff] }
  0xa8   :  { %2041 = vmatpush.bf16.msra.mxu2 %v3283_v62  ;;  %v3304_v62 = vld [vmem:[#allocation5 + $0x550] sm:$0xff] }
  0xa9   :  { %2054 = vmatpush.bf16.msra.mxu3 %v3291_v63 }
  0xaa   :  { %2016 = vmatpush.bf16.msra.mxu0 %v3266_v0 }
  0xab   :  { %2029 = vmatpush.bf16.msra.mxu1 %v3274_v1  ;;  %v3312_v1 = vld [vmem:[#allocation5 + $0x590] sm:$0xff] }
  0xac   :  { %2042 = vmatpush.bf16.msra.mxu2 %v3282_v2  ;;  %v3320_v2 = vld [vmem:[#allocation5 + $0x5d0] sm:$0xff] }
  0xad   :  { %2055 = vmatpush.bf16.msra.mxu3 %v3290_v3  ;;  %v3295_v3 = vld [vmem:[#allocation5 + $0x508] sm:$0xff] }
  0xae   :  { %2017 = vmatpush.bf16.msra.mxu0 %v3265_v4  ;;  %v3303_v4 = vld [vmem:[#allocation5 + $0x548] sm:$0xff] }
  0xaf   :  { %2030 = vmatpush.bf16.msra.mxu1 %v3273_v5  ;;  %v3311_v5 = vld [vmem:[#allocation5 + $0x588] sm:$0xff] }
  0xb0   :  { %2043 = vmatpush.bf16.msra.mxu2 %v3281_v6  ;;  %v3319_v6 = vld [vmem:[#allocation5 + $0x5c8] sm:$0xff] }
  0xb1   :  { %2056 = vmatpush.bf16.msra.mxu3 %v3289_v7 }
  0xb2   :  { %2018 = vmatpush.bf16.msra.mxu0 %v3264_v8  ;;  %v3294_v8 = vld [vmem:[#allocation5 + $0x500] sm:$0xff] }
  0xb3   :  { %2031 = vmatpush.bf16.msra.mxu1 %v3272_v9 }
  0xb4   :  { %2044 = vmatpush.bf16.msra.mxu2 %v3280_v10  ;;  %v3302_v10 = vld [vmem:[#allocation5 + $0x540] sm:$0xff] }
  0xb5   :  { %2057 = vmatpush.bf16.msra.mxu3 %v3288_v11  ;;  %v3310_v11 = vld [vmem:[#allocation5 + $0x580] sm:$0xff] }
  0xb6   :  { %2019 = vmatpush.bf16.msra.mxu0 %v3263_v12  ;;  %v3318_v12 = vld [vmem:[#allocation5 + $0x5c0] sm:$0xff] }
  0xb7   :  { %2032 = vmatpush.bf16.msra.mxu1 %v3271_v15  ;;  %v215_v15 = vld.sshfl [vmem:[#allocation1 + $0x30] sm:$0xff pattern:$0x73625140] }
  0xb8   :  { %2045 = vmatpush.bf16.msra.mxu2 %v3279_v18  ;;  %v262_v18 = vpack.c.bf16 %v214_v14, %v214_v14  ;;  %v3338_v14 = vld [vmem:[#allocation10 + $0x20] sm:$0xff] }
  0xb9   :  { %2058 = vmatpush.bf16.msra.mxu3 %v3287_v19  ;;  %v263_v19 = vpack.c.bf16 %v215_v15, %v215_v15 }
  0xba   :  { %2020 = vmatpush.bf16.msra.mxu0 %v3262_v20  ;;  %v1814_v45 = vpop.f32.mrf.mxu0  ;;  %v264_v20 = vpack.c.bf16 %v216_v16, %v216_v16  ;;  %v3337_v16 = vld [vmem:[#allocation10 + $0x18] sm:$0xff] }
  0xbb   :  { %2033 = vmatpush.bf16.msra.mxu1 %v3270_v21  ;;  %v1815_v48 = vadd.f32 %v3355_v42, %v1814_v45  ;;  %v1827_v49 = vpop.f32.mrf.mxu1 }
  0xbc   :  { %2046 = vmatpush.bf16.msra.mxu2 %v3278_v22 }
  0xbd   :  { %2059 = vmatpush.bf16.msra.mxu3 %v3286_v23  ;;  %2021 = vmatmul.bf16.vlgmr.msra.gmra.mxu0 %v257_v32  ;;  %v1828_v52 = vadd.f32 %v1827_v49, %v1815_v48  ;;  %v3333_v49 = vld [vmem:[#allocation8 + $0x38] sm:$0xff] }
  0xbe   :  { %2065 = vmatpush.bf16.msrb.mxu0 %v3301_v24  ;;  %2034 = vmatmul.bf16.vlgmr.msra.gmra.mxu1 %v258_v34 }
  0xbf   :  { %2078 = vmatpush.bf16.msrb.mxu1 %v3309_v25  ;;  %2047 = vmatmul.bf16.vlgmr.msra.gmra.mxu2 %v259_v33 }
  0xc0   :  { %2091 = vmatpush.bf16.msrb.mxu2 %v3317_v30  ;;  %2060 = vmatmul.bf16.vlgmr.msra.gmra.mxu3 %v260_v35 }
  0xc1   :  { %2104 = vmatpush.bf16.msrb.mxu3 %v3325_v31 }
  0xc2   :  { %2066 = vmatpush.bf16.msrb.mxu0 %v3300_v36  ;;  %v1840_v57 = vpop.f32.mrf.mxu2  ;;  %v1816_v60 = vpop.f32.mrf.mxu0 }
  0xc3   :  { %2079 = vmatpush.bf16.msrb.mxu1 %v3308_v37  ;;  %v1841_v58 = vadd.f32 %v1840_v57, %v1828_v52  ;;  %v1853_v59 = vpop.f32.mrf.mxu3  ;;  %v1829_v0 = vpop.f32.mrf.mxu1  ;;  %v3332_v52 = vld [vmem:[#allocation8 + $0x30] sm:$0xff]  ;;  %v3329_v57 = vld [vmem:[#allocation8 + $0x18] sm:$0xff] }
  0xc4   :  { %2092 = vmatpush.bf16.msrb.mxu2 %v3316_v38 }
  0xc5   :  { %2105 = vmatpush.bf16.msrb.mxu3 %v3324_v39  ;;  %v1854_v63 = vadd.f32 %v1853_v59, %v1841_v58  ;;  %v3328_v59 = vld [vmem:[#allocation8 + $0x10] sm:$0xff] }
  0xc6   :  { %2067 = vmatpush.bf16.msrb.mxu0 %v3299_v40 }
  0xc7   :  { %2080 = vmatpush.bf16.msrb.mxu1 %v3307_v41 }
  0xc8   :  { %2093 = vmatpush.bf16.msrb.mxu2 %v3315_v43 }
  0xc9   :  { %2106 = vmatpush.bf16.msrb.mxu3 %v3323_v44 }
  0xca   :  { %2068 = vmatpush.bf16.msrb.mxu0 %v3298_v46  ;;  %v1842_v7 = vpop.f32.mrf.mxu2 }
  0xcb   :  { %2081 = vmatpush.bf16.msrb.mxu1 %v3306_v47  ;;  %v1855_v9 = vpop.f32.mrf.mxu3 }
  0xcc   :  { %2094 = vmatpush.bf16.msrb.mxu2 %v3314_v50  ;;  %v3340_v9 = vld [vmem:[#allocation10 + $0x30] sm:$0xff] }
  0xcd   :  { %2107 = vmatpush.bf16.msrb.mxu3 %v3322_v51 }
  0xce   :  { %2069 = vmatpush.bf16.msrb.mxu0 %v3297_v53  ;;  %v3331_v53 = vld [vmem:[#allocation8 + $0x28] sm:$0xff] }
  0xcf   :  { %2082 = vmatpush.bf16.msrb.mxu1 %v3305_v54 }
  0xd0   :  { %2095 = vmatpush.bf16.msrb.mxu2 %v3313_v55 }
  0xd1   :  { %2108 = vmatpush.bf16.msrb.mxu3 %v3321_v56  ;;  %v3330_v56 = vld [vmem:[#allocation8 + $0x20] sm:$0xff] }
  0xd2   :  { %2070 = vmatpush.bf16.msrb.mxu0 %v3296_v61  ;;  %v3327_v61 = vld [vmem:[#allocation8 + $0x8] sm:$0xff] }
  0xd3   :  { %2083 = vmatpush.bf16.msrb.mxu1 %v3304_v62 }
  0xd4   :  { %2096 = vmatpush.bf16.msrb.mxu2 %v3312_v1 }
  0xd5   :  { %2109 = vmatpush.bf16.msrb.mxu3 %v3320_v2  ;;  %v3326_v2 = vld [vmem:[#allocation8] sm:$0xff] }
  0xd6   :  { %2071 = vmatpush.bf16.msrb.mxu0 %v3295_v3 }
  0xd7   :  { %2084 = vmatpush.bf16.msrb.mxu1 %v3303_v4 }
  0xd8   :  { %2097 = vmatpush.bf16.msrb.mxu2 %v3311_v5 }
  0xd9   :  { %2110 = vmatpush.bf16.msrb.mxu3 %v3319_v6  ;;  %v3341_v6 = vld [vmem:[#allocation10 + $0x38] sm:$0xff] }
  0xda   :  { %2072 = vmatpush.bf16.msrb.mxu0 %v3294_v8  ;;  %v1866_v21 = vpop.f32.mrf.mxu0 }
  0xdb   :  { %2085 = vmatpush.bf16.msrb.mxu1 %v3302_v10  ;;  %v1867_v22 = vadd.f32 %v1866_v21, %v1854_v63  ;;  %v1879_v23 = vpop.f32.mrf.mxu1  ;;  %v3336_v21 = vld [vmem:[#allocation10 + $0x10] sm:$0xff] }
  0xdc   :  { %2098 = vmatpush.bf16.msrb.mxu2 %v3310_v11 }
  0xdd   :  { %2111 = vmatpush.bf16.msrb.mxu3 %v3318_v12  ;;  %2073 = vmatmul.bf16.vlgmr.msrb.gmra.mxu0 %v261_v17  ;;  %v1880_v24 = vadd.f32 %v1879_v23, %v1867_v22  ;;  %v3339_v12 = vld [vmem:[#allocation10 + $0x28] sm:$0xff] }
  0xde   :  { %2086 = vmatmul.bf16.vlgmr.msrb.gmra.mxu1 %v262_v18  ;;  %2183 = vmatpush.bf16.msra.mxu0 %v3333_v49  ;;  %v3335_v23 = vld [vmem:[#allocation10 + $0x8] sm:$0xff] }
  0xdf   :  { %2099 = vmatmul.bf16.vlgmr.msrb.gmra.mxu2 %v263_v19  ;;  %2266 = vmatpush.bf16.msra.mxu1 %v3341_v6 }
  0xe0   :  { %2112 = vmatmul.bf16.vlgmr.msrb.gmra.mxu3 %v264_v20 }
  0xe2   :  { %v1892_v25 = vpop.f32.mrf.mxu2  ;;  %v1868_v28 = vpop.f32.mrf.mxu0  ;;  %2184 = vmatpush.bf16.msra.mxu0 %v3332_v52 }
  0xe3   :  { %v1893_v26 = vadd.f32 %v1892_v25, %v1880_v24  ;;  %v1905_v27 = vpop.f32.mrf.mxu3  ;;  %v1881_v30 = vpop.f32.mrf.mxu1  ;;  %2267 = vmatpush.bf16.msra.mxu1 %v3340_v9 }
  0xe5   :  { %v1906_v29 = vadd.f32 %v1905_v27, %v1893_v26 }
  0xe6   :  { %2185 = vmatpush.bf16.msra.mxu0 %v3331_v53 }
  0xe7   :  { %2268 = vmatpush.bf16.msra.mxu1 %v3339_v12 }
  0xea   :  { %v1894_v31 = vpop.f32.mrf.mxu2  ;;  %2186 = vmatpush.bf16.msra.mxu0 %v3330_v56 }
  0xeb   :  { %v1907_v32 = vpop.f32.mrf.mxu3  ;;  %2269 = vmatpush.bf16.msra.mxu1 %v3338_v14 }
  0xee   :  { %2187 = vmatpush.bf16.msra.mxu0 %v3329_v57 }
  0xef   :  { %2270 = vmatpush.bf16.msra.mxu1 %v3337_v16 }
  0xf2   :  { %2188 = vmatpush.bf16.msra.mxu0 %v3328_v59 }
  0xf3   :  { %2271 = vmatpush.bf16.msra.mxu1 %v3336_v21 }
  0xf6   :  { %2189 = vmatpush.bf16.msra.mxu0 %v3327_v61 }
  0xf7   :  { %2272 = vmatpush.bf16.msra.mxu1 %v3335_v23 }
  0xfa   :  { %v1918_v33 = vpop.f32.mrf.mxu0  ;;  %2190 = vmatpush.bf16.msra.mxu0 %v3326_v2 }
  0xfb   :  { %v1919_v34 = vadd.f32 %v1918_v33, %v1906_v29  ;;  %v1931_v35 = vpop.f32.mrf.mxu1 }
  0xfd   :  { %v1932_v36 = vadd.f32 %v1931_v35, %v1919_v34  ;;  %v3334_v34 = vld [vmem:[#allocation10] sm:$0xff] }
  0xfe   :  { %2273 = vmatpush.bf16.msra.mxu1 %v3334_v34 }
 0x102   :  { %v1944_v37 = vpop.f32.mrf.mxu2  ;;  %v1920_v40 = vpop.f32.mrf.mxu0 }
 0x103   :  { %v1945_v38 = vadd.f32 %v1944_v37, %v1932_v36  ;;  %v1957_v39 = vpop.f32.mrf.mxu3  ;;  %v1933_v42 = vpop.f32.mrf.mxu1 }
 0x105   :  { %v1958_v41 = vadd.f32 %v1957_v39, %v1945_v38  ;;  %v3356_v39 = vld [vmem:[#allocation11] ss:$0 sm:$0xff] }
 0x10a   :  { %v1946_v43 = vpop.f32.mrf.mxu2 }
 0x10b   :  { %v1959_v44 = vpop.f32.mrf.mxu3 }
 0x11a   :  { %v1970_v45 = vpop.f32.mrf.mxu0 }
 0x11b   :  { %v1983_v46 = vpop.f32.mrf.mxu1  ;;  %v1971_v63 = vadd.f32 %v1970_v45, %v1958_v41 }
 0x11d   :  { %v1984_v4 = vadd.f32 %v1983_v46, %v1971_v63 }
 0x122   :  { %v1996_v47 = vpop.f32.mrf.mxu2  ;;  %v1972_v50 = vpop.f32.mrf.mxu0 }
 0x123   :  { %v2009_v48 = vpop.f32.mrf.mxu3  ;;  %v1985_v51 = vpop.f32.mrf.mxu1  ;;  %v1997_v5 = vadd.f32 %v1996_v47, %v1984_v4 }
 0x125   :  { %v2010_v10 = vadd.f32 %v2009_v48, %v1997_v5 }
 0x12a   :  { %v1998_v54 = vpop.f32.mrf.mxu2 }
 0x12b   :  { %v2011_v55 = vpop.f32.mrf.mxu3 }
 0x13a   :  { %v2022_v58 = vpop.f32.mrf.mxu0 }
 0x13b   :  { %v2035_v60 = vpop.f32.mrf.mxu1  ;;  %v2023_v11 = vadd.f32 %v2022_v58, %v2010_v10 }
 0x13d   :  { %v2036_v13 = vadd.f32 %v2035_v60, %v2023_v11 }
 0x142   :  { %v2048_v62 = vpop.f32.mrf.mxu2  ;;  %v2024_v1 = vpop.f32.mrf.mxu0 }
 0x143   :  { %v2061_v0 = vpop.f32.mrf.mxu3  ;;  %v2037_v3 = vpop.f32.mrf.mxu1  ;;  %v2049_v15 = vadd.f32 %v2048_v62, %v2036_v13 }
 0x145   :  { %v2062_v17 = vadd.f32 %v2061_v0, %v2049_v15 }
 0x14a   :  { %v2050_v7 = vpop.f32.mrf.mxu2 }
 0x14b   :  { %v2063_v8 = vpop.f32.mrf.mxu3 }
 0x15a   :  { %v2074_v18 = vpop.f32.mrf.mxu0 }
 0x15b   :  { %v2087_v19 = vpop.f32.mrf.mxu1  ;;  %v2075_v20 = vadd.f32 %v2074_v18, %v2062_v17 }
 0x15d   :  { %v2088_v22 = vadd.f32 %v2087_v19, %v2075_v20 }
 0x162   :  { %v2100_v24 = vpop.f32.mrf.mxu2  ;;  %v2076_v27 = vpop.f32.mrf.mxu0 }
 0x163   :  { %v2113_v25 = vpop.f32.mrf.mxu3  ;;  %v2101_v26 = vadd.f32 %v2100_v24, %v2088_v22  ;;  %v2089_v28 = vpop.f32.mrf.mxu1 }
 0x165   :  { %v2114_v29 = vadd.f32 %v2113_v25, %v2101_v26 }
 0x167   :  { %v2117_v30 = vmax.f32 %v2114_v29, 0.0 }
 0x169   :  { %v2118_v31 = vpack.c.bf16 %v2117_v30, %v2117_v30 }
 0x16a   :  { %v2102_v32 = vpop.f32.mrf.mxu2 }
 0x16b   :  { %v2115_v33 = vpop.f32.mrf.mxu3  ;;  %2191 = vmatmul.bf16.vlgmr.msra.gmra.mxu0 %v2118_v31 }
 0x1e8   :  { %v2192_v35 = vpop.f32.mrf.mxu0 }
 0x1e9   :  { %v2196_v36 = vmax.f32 %v2192_v35, 0.0 }
 0x1eb   :  { %v2197_v37 = vpack.c.bf16 %v2196_v36, %v2196_v36 }
 0x1ed   :  { %2274 = vmatmul.bf16.vlgmr.msra.gmra.mxu1 %v2197_v37 }
 0x1f0   :  { %v2194_v38 = vpop.f32.mrf.mxu0 }
 0x26a   :  { %v2275_v40 = vpop.f32.mrf.mxu1 }
 0x26b   :  { %v2276_v41 = vadd.f32 %v3356_v39, %v2275_v40 }
 0x26d   :  { %2279 = vst [vmem:[#allocation13] sm:$0xff] %v2276_v41 }
 0x272   :  { %v2277_v42 = vpop.f32.mrf.mxu1 }
 0x273   :  { %2283 = vsyncadd [#allocation4], 96  ;;  %s2286_s27 = sshll.u32 %s3619_s6, 4  ;;  %s3545_s28 = smov [#allocation13]   ;;  %s2287_s27 = int_to_ptr.hbm [resolvable:$true] %s2286_s27 }
 0x274   :  { %s2284_s29 = sshll.u32 %s3545_s28, 4  ;;  %s3546_s30 = smov 32   ;;  %s2285_s29 = int_to_ptr.vmem [resolvable:$true] %s2284_s29 }
 0x275   :  { %s3547_s7 = smov 2  }
 0x276   :  { %2292 = dma.vmem_to_hbm [thread:$0]  %s2285_s29, 32, %s2287_s27, [#allocation4], %s3546_s30, %s3546_s30, %s3547_s7  }
 0x277   :  { %3533 = dma.done.wait [#allocation4], 128  }
 0x278   :  { %3534 = vsyncadd [#allocation4], 4294967168 }
 0x279   :  { %2297 = vsyncpa [#allocation3], 1 }
 0x27a   :  { %2298 = vsyncpa [#allocation6], 1 }
 0x27b   :  { %2299 = vsyncpa [#allocation9], 1 }
 0x27c   :  { %2300 = vsyncpa [#allocation12], 1 }
 0x27d   :  { %2301 = vsyncpa [#allocation4], 1 }

</bundles_post_ra>
